<compile_context>
chip_gen: v6e
topology: v6e:2x2x1
jax: 0.10.0
libtpu: 0.0.40
codegen_flags: <defaults>
</compile_context>

<pallas_src>
import functools

import jax
import jax.numpy as jnp
from jax.experimental import pallas as pl
from jax.experimental.pallas import tpu as pltpu

LANE = 128      # lane width (last dim alignment)
SUBLANE = 8     # sublane width (second-to-last dim alignment)


def _round_up(x: int, m: int) -> int:
    return ((x + m - 1) // m) * m


def _pad2d(a, rows: int, cols: int):
    """Zero-pad a 2-D array up to (rows, cols)."""
    return jnp.pad(a, ((0, rows - a.shape[0]), (0, cols - a.shape[1])))


# ----------------------------------------------------------------------------
# Fused Pallas kernel: full VAE forward for one batch tile.
# ----------------------------------------------------------------------------
def _vae_fused_kernel(*refs, n_enc: int, n_dec: int, h_pad: int):
    """Inputs:  x, eps, [enc (w,b)]*n_enc, head_w, head_b, [dec (w,b)]*n_dec
    Outputs: x_hat, mean, log_var, z  (all lane-padded; padded lanes are zero)."""
    x_ref, eps_ref = refs[0], refs[1]
    n_in_params = 2 * n_enc + 2 + 2 * n_dec
    p = refs[2:2 + n_in_params]
    xhat_ref, mean_ref, logvar_ref, z_ref = refs[2 + n_in_params:]

    # ---- encoder hidden layers: Linear + SiLU ----
    h = x_ref[...]
    for i in range(n_enc):
        w = p[2 * i][...]
        b = p[2 * i + 1][...]
        h = jnp.dot(h, w, preferred_element_type=jnp.float32) + b
        h = h * jax.nn.sigmoid(h)          # SiLU

    # ---- fused mean || log_var head (single matmul) ----
    off = 2 * n_enc
    head_w = p[off][...]                   # [Denc_pad, 2*h_pad]
    head_b = p[off + 1][...]               # [1, 2*h_pad]
    ml = jnp.dot(h, head_w, preferred_element_type=jnp.float32) + head_b
    mean = ml[:, :h_pad]                   # lane-aligned static slices
    log_var = ml[:, h_pad:]

    # ---- reparametrisation: z = mean + exp(0.5*log_var) * eps ----
    z = mean + jnp.exp(0.5 * log_var) * eps_ref[...]
    # latent_fn is None in the reference module -> identity.

    # ---- decoder: SiLU between layers, none after the last ----
    x_hat = z
    off2 = off + 2
    for i in range(n_dec):
        w = p[off2 + 2 * i][...]
        b = p[off2 + 2 * i + 1][...]
        x_hat = jnp.dot(x_hat, w, preferred_element_type=jnp.float32) + b
        if i < n_dec - 1:
            x_hat = x_hat * jax.nn.sigmoid(x_hat)

    xhat_ref[...] = x_hat.astype(xhat_ref.dtype)
    mean_ref[...] = mean.astype(mean_ref.dtype)
    logvar_ref[...] = log_var.astype(logvar_ref.dtype)
    z_ref[...] = z.astype(z_ref.dtype)


# ----------------------------------------------------------------------------
# Wrapper: pad to TPU-friendly shapes, call the fused kernel once, slice back.
# ----------------------------------------------------------------------------
def vae_forward(params, X, eps):
    """Returns (X_hat, mean, log_var, z), matching the PyTorch VAE.forward."""
    B, d_in = X.shape
    H = eps.shape[1]
    enc, dec = params["enc"], params["dec"]
    n_enc, n_dec = len(enc), len(dec)

    # --- padded dims (lane-dense features, sublane-aligned batch) ---
    h_pad = _round_up(H, LANE)
    d_in_pad = _round_up(d_in, LANE)
    d_out = dec[-1][0].shape[1]
    d_out_pad = _round_up(d_out, LANE)

    b_pad0 = _round_up(B, SUBLANE)
    tile_b = 256 if b_pad0 >= 256 else b_pad0     # MXU-sized tiles for big batches
    b_pad = _round_up(B, tile_b)
    n_tiles = b_pad // tile_b

    x_p = _pad2d(X, b_pad, d_in_pad)
    eps_p = _pad2d(eps, b_pad, h_pad)

    flat_params = []
    in_specs = [
        pl.BlockSpec((tile_b, d_in_pad), lambda i: (i, 0)),   # X tile
        pl.BlockSpec((tile_b, h_pad), lambda i: (i, 0)),      # eps tile
    ]

    def add_layer(w, b):
        din_p = _round_up(w.shape[0], LANE)
        dout_p = _round_up(w.shape[1], LANE)
        flat_params.append(_pad2d(w, din_p, dout_p))
        flat_params.append(_pad2d(b, 1, dout_p))
        in_specs.append(pl.BlockSpec((din_p, dout_p), lambda i: (0, 0)))
        in_specs.append(pl.BlockSpec((1, dout_p), lambda i: (0, 0)))

    for w, b in enc:
        add_layer(w, b)

    # Concatenated mean||log_var head (each half padded to h_pad lanes).
    mw, mb = params["mean"]
    lw, lb = params["log_var"]
    enc_out_pad = _round_up(mw.shape[0], LANE)
    head_w = jnp.concatenate(
        [_pad2d(mw, enc_out_pad, h_pad), _pad2d(lw, enc_out_pad, h_pad)], axis=1)
    head_b = jnp.concatenate([_pad2d(mb, 1, h_pad), _pad2d(lb, 1, h_pad)], axis=1)
    flat_params.append(head_w)
    flat_params.append(head_b)
    in_specs.append(pl.BlockSpec((enc_out_pad, 2 * h_pad), lambda i: (0, 0)))
    in_specs.append(pl.BlockSpec((1, 2 * h_pad), lambda i: (0, 0)))

    for w, b in dec:
        add_layer(w, b)

    kernel = functools.partial(
        _vae_fused_kernel, n_enc=n_enc, n_dec=n_dec, h_pad=h_pad)

    out_shapes = (
        jax.ShapeDtypeStruct((b_pad, d_out_pad), X.dtype),   # x_hat
        jax.ShapeDtypeStruct((b_pad, h_pad), X.dtype),       # mean
        jax.ShapeDtypeStruct((b_pad, h_pad), X.dtype),       # log_var
        jax.ShapeDtypeStruct((b_pad, h_pad), X.dtype),       # z
    )
    out_specs = (
        pl.BlockSpec((tile_b, d_out_pad), lambda i: (i, 0)),
        pl.BlockSpec((tile_b, h_pad), lambda i: (i, 0)),
        pl.BlockSpec((tile_b, h_pad), lambda i: (i, 0)),
        pl.BlockSpec((tile_b, h_pad), lambda i: (i, 0)),
    )

    x_hat_p, mean_p, logvar_p, z_p = pl.pallas_call(
        kernel,
        out_shape=out_shapes,
        grid_spec=pltpu.PrefetchScalarGridSpec(
            num_scalar_prefetch=0,
            grid=(n_tiles,),
            in_specs=in_specs,
            out_specs=out_specs,
        ),
        compiler_params=pltpu.CompilerParams(
            dimension_semantics=("parallel",),
        ),
    )(x_p, eps_p, *flat_params)

    return (x_hat_p[:B, :d_out],
            mean_p[:B, :H],
            logvar_p[:B, :H],
            z_p[:B, :H])


# ----------------------------------------------------------------------------
# Parameter init (PyTorch-Linear-like, weights stored pre-transposed)
# ----------------------------------------------------------------------------
def init_linear(key, d_in, d_out, dtype=jnp.float32):
    kw, kb = jax.random.split(key)
    bound = 1.0 / jnp.sqrt(jnp.array(d_in, dtype))
    w = jax.random.uniform(kw, (d_in, d_out), dtype, -bound, bound)  # [Din, Dout]
    b = jax.random.uniform(kb, (1, d_out), dtype, -bound, bound)
    return w, b


def init_vae_params(key, encoder_shape, decoder_shape, hidden_dim):
    params = {"enc": [], "dec": []}
    for i in range(len(encoder_shape) - 1):
        key, sub = jax.random.split(key)
        params["enc"].append(init_linear(sub, encoder_shape[i], encoder_shape[i + 1]))
    key, k_mean, k_lv = jax.random.split(key, 3)
    params["mean"] = init_linear(k_mean, encoder_shape[-1], hidden_dim)
    params["log_var"] = init_linear(k_lv, encoder_shape[-1], hidden_dim)
    dec_shape = (hidden_dim, *decoder_shape)
    for i in range(len(dec_shape) - 1):
        key, sub = jax.random.split(key)
        params["dec"].append(init_linear(sub, dec_shape[i], dec_shape[i + 1]))
    return params


# ----------------------------------------------------------------------------
# Main
# ----------------------------------------------------------------------------
if __name__ == "__main__":
    batch = 8
    encoder_shape = (32, 64)   # input features = 32, encoder hidden = 64
    decoder_shape = (64, 32)   # decoder hidden = 64, output features = 32
    hidden_dim = 16

    key = jax.random.PRNGKey(0)
    k_params, k_x, k_eps = jax.random.split(key, 3)

    params = init_vae_params(k_params, encoder_shape, decoder_shape, hidden_dim)
    X = jax.random.normal(k_x, (batch, encoder_shape[0]), jnp.float32)
    # epsilon ~ N(0,1), same shape as the latent (torch.randn_like equivalent,
    # drawn deterministically outside the kernel).
    eps = jax.random.normal(k_eps, (batch, hidden_dim), jnp.float32)

    fwd = jax.jit(vae_forward)
    X_hat, mean, log_var, z = fwd(params, X, eps)
    jax.block_until_ready((X_hat, mean, log_var, z))

    # Pure-JAX reference check (same math, no Pallas).
    def ref_forward(params, X, eps):
        silu = lambda t: t * jax.nn.sigmoid(t)
        h = X
        for w, b in params["enc"]:
            h = silu(h @ w + b)
        mean = h @ params["mean"][0] + params["mean"][1]
        log_var = h @ params["log_var"][0] + params["log_var"][1]
        z = mean + jnp.exp(0.5 * log_var) * eps
        x_hat = z
        n = len(params["dec"])
        for i, (w, b) in enumerate(params["dec"]):
            x_hat = x_hat @ w + b
            if i < n - 1:
                x_hat = silu(x_hat)
        return x_hat, mean, log_var, z

    ref = ref_forward(params, X, eps)
    for got, want in zip((X_hat, mean, log_var, z), ref):
        assert got.shape == want.shape and got.dtype == want.dtype
        assert jnp.allclose(got, want, atol=1e-5, rtol=1e-5)

    print("KERNEL_OK")
</pallas_src>

<mosaic_0001>
module attributes {stable_mosaic.version = 11 : i64} {
  func.func @_vae_fused_kernel(%arg0: i32, %arg1: memref<8x128xf32, #tpu.memory_space<vmem>>, %arg2: memref<8x128xf32, #tpu.memory_space<vmem>>, %arg3: memref<128x128xf32, #tpu.memory_space<vmem>>, %arg4: memref<1x128xf32, #tpu.memory_space<vmem>>, %arg5: memref<128x256xf32, #tpu.memory_space<vmem>>, %arg6: memref<1x256xf32, #tpu.memory_space<vmem>>, %arg7: memref<128x128xf32, #tpu.memory_space<vmem>>, %arg8: memref<1x128xf32, #tpu.memory_space<vmem>>, %arg9: memref<128x128xf32, #tpu.memory_space<vmem>>, %arg10: memref<1x128xf32, #tpu.memory_space<vmem>>, %arg11: memref<8x128xf32, #tpu.memory_space<vmem>>, %arg12: memref<8x128xf32, #tpu.memory_space<vmem>>, %arg13: memref<8x128xf32, #tpu.memory_space<vmem>>, %arg14: memref<8x128xf32, #tpu.memory_space<vmem>>) attributes {dimension_semantics = [#tpu.dimension_semantics<parallel>], iteration_bounds = array<i64: 1>, scalar_prefetch = 0 : i64, scratch_operands = 0 : i64, tpu.core_type = #tpu.core_type<tc>, window_params = [{transform_indices = @transform_0, window_bounds = array<i64: 8, 128>}, {transform_indices = @transform_1, window_bounds = array<i64: 8, 128>}, {pipeline_mode = #tpu.pipeline_mode<synchronous>, transform_indices = @transform_2, window_bounds = array<i64: 128, 128>}, {pipeline_mode = #tpu.pipeline_mode<synchronous>, transform_indices = @transform_3, window_bounds = array<i64: 1, 128>}, {pipeline_mode = #tpu.pipeline_mode<synchronous>, transform_indices = @transform_4, window_bounds = array<i64: 128, 256>}, {pipeline_mode = #tpu.pipeline_mode<synchronous>, transform_indices = @transform_5, window_bounds = array<i64: 1, 256>}, {pipeline_mode = #tpu.pipeline_mode<synchronous>, transform_indices = @transform_6, window_bounds = array<i64: 128, 128>}, {pipeline_mode = #tpu.pipeline_mode<synchronous>, transform_indices = @transform_7, window_bounds = array<i64: 1, 128>}, {pipeline_mode = #tpu.pipeline_mode<synchronous>, transform_indices = @transform_8, window_bounds = array<i64: 128, 128>}, {pipeline_mode = #tpu.pipeline_mode<synchronous>, transform_indices = @transform_9, window_bounds = array<i64: 1, 128>}, {transform_indices = @transform_10, window_bounds = array<i64: 8, 128>}, {transform_indices = @transform_11, window_bounds = array<i64: 8, 128>}, {transform_indices = @transform_12, window_bounds = array<i64: 8, 128>}, {transform_indices = @transform_13, window_bounds = array<i64: 8, 128>}]} {
    %c0 = arith.constant 0 : index
    %c0_0 = arith.constant 0 : index
    %0 = vector.load %arg1[%c0, %c0_0] : memref<8x128xf32, #tpu.memory_space<vmem>>, vector<8x128xf32>
    %c0_1 = arith.constant 0 : index
    %c0_2 = arith.constant 0 : index
    %1 = vector.load %arg3[%c0_1, %c0_2] : memref<128x128xf32, #tpu.memory_space<vmem>>, vector<128x128xf32>
    %c0_3 = arith.constant 0 : index
    %c0_4 = arith.constant 0 : index
    %2 = vector.load %arg4[%c0_3, %c0_4] : memref<1x128xf32, #tpu.memory_space<vmem>>, vector<1x128xf32>
    %cst = arith.constant dense<0.000000e+00> : vector<8x128xf32>
    %3 = tpu.matmul %0, %1, %cst {dimension_numbers = #tpu.dot_dimension_numbers<[1], [0], [0], [1], [0, 0, 1, 1], [], []>} : vector<8x128xf32>, vector<128x128xf32>, vector<8x128xf32> -> vector<8x128xf32>
    %4 = vector.broadcast %2 : vector<1x128xf32> to vector<8x128xf32>
    %5 = arith.addf %3, %4 : vector<8x128xf32>
    %6 = arith.negf %5 : vector<8x128xf32>
    %7 = math.exp %6 : vector<8x128xf32>
    %cst_5 = arith.constant 1.000000e+00 : f32
    %8 = vector.broadcast %cst_5 : f32 to vector<8x128xf32>
    %9 = arith.addf %8, %7 : vector<8x128xf32>
    %10 = arith.divf %8, %9 : vector<8x128xf32>
    %11 = arith.mulf %5, %10 : vector<8x128xf32>
    %c0_6 = arith.constant 0 : index
    %c0_7 = arith.constant 0 : index
    %12 = vector.load %arg5[%c0_6, %c0_7] : memref<128x256xf32, #tpu.memory_space<vmem>>, vector<128x256xf32>
    %c0_8 = arith.constant 0 : index
    %c0_9 = arith.constant 0 : index
    %13 = vector.load %arg6[%c0_8, %c0_9] : memref<1x256xf32, #tpu.memory_space<vmem>>, vector<1x256xf32>
    %cst_10 = arith.constant dense<0.000000e+00> : vector<8x256xf32>
    %14 = tpu.matmul %11, %12, %cst_10 {dimension_numbers = #tpu.dot_dimension_numbers<[1], [0], [0], [1], [0, 0, 1, 1], [], []>} : vector<8x128xf32>, vector<128x256xf32>, vector<8x256xf32> -> vector<8x256xf32>
    %15 = vector.broadcast %13 : vector<1x256xf32> to vector<8x256xf32>
    %16 = arith.addf %14, %15 : vector<8x256xf32>
    %17 = vector.extract_strided_slice %16 {offsets = [0, 0], sizes = [8, 128], strides = [1, 1]} : vector<8x256xf32> to vector<8x128xf32>
    %18 = vector.extract_strided_slice %16 {offsets = [0, 128], sizes = [8, 128], strides = [1, 1]} : vector<8x256xf32> to vector<8x128xf32>
    %cst_11 = arith.constant 5.000000e-01 : f32
    %19 = vector.broadcast %cst_11 : f32 to vector<8x128xf32>
    %20 = arith.mulf %19, %18 : vector<8x128xf32>
    %21 = math.exp %20 : vector<8x128xf32>
    %c0_12 = arith.constant 0 : index
    %c0_13 = arith.constant 0 : index
    %22 = vector.load %arg2[%c0_12, %c0_13] : memref<8x128xf32, #tpu.memory_space<vmem>>, vector<8x128xf32>
    %23 = arith.mulf %21, %22 : vector<8x128xf32>
    %24 = arith.addf %17, %23 : vector<8x128xf32>
    %c0_14 = arith.constant 0 : index
    %c0_15 = arith.constant 0 : index
    %25 = vector.load %arg7[%c0_14, %c0_15] : memref<128x128xf32, #tpu.memory_space<vmem>>, vector<128x128xf32>
    %c0_16 = arith.constant 0 : index
    %c0_17 = arith.constant 0 : index
    %26 = vector.load %arg8[%c0_16, %c0_17] : memref<1x128xf32, #tpu.memory_space<vmem>>, vector<1x128xf32>
    %cst_18 = arith.constant dense<0.000000e+00> : vector<8x128xf32>
    %27 = tpu.matmul %24, %25, %cst_18 {dimension_numbers = #tpu.dot_dimension_numbers<[1], [0], [0], [1], [0, 0, 1, 1], [], []>} : vector<8x128xf32>, vector<128x128xf32>, vector<8x128xf32> -> vector<8x128xf32>
    %28 = vector.broadcast %26 : vector<1x128xf32> to vector<8x128xf32>
    %29 = arith.addf %27, %28 : vector<8x128xf32>
    %30 = arith.negf %29 : vector<8x128xf32>
    %31 = math.exp %30 : vector<8x128xf32>
    %cst_19 = arith.constant 1.000000e+00 : f32
    %32 = vector.broadcast %cst_19 : f32 to vector<8x128xf32>
    %33 = arith.addf %32, %31 : vector<8x128xf32>
    %34 = arith.divf %32, %33 : vector<8x128xf32>
    %35 = arith.mulf %29, %34 : vector<8x128xf32>
    %c0_20 = arith.constant 0 : index
    %c0_21 = arith.constant 0 : index
    %36 = vector.load %arg9[%c0_20, %c0_21] : memref<128x128xf32, #tpu.memory_space<vmem>>, vector<128x128xf32>
    %c0_22 = arith.constant 0 : index
    %c0_23 = arith.constant 0 : index
    %37 = vector.load %arg10[%c0_22, %c0_23] : memref<1x128xf32, #tpu.memory_space<vmem>>, vector<1x128xf32>
    %cst_24 = arith.constant dense<0.000000e+00> : vector<8x128xf32>
    %38 = tpu.matmul %35, %36, %cst_24 {dimension_numbers = #tpu.dot_dimension_numbers<[1], [0], [0], [1], [0, 0, 1, 1], [], []>} : vector<8x128xf32>, vector<128x128xf32>, vector<8x128xf32> -> vector<8x128xf32>
    %39 = vector.broadcast %37 : vector<1x128xf32> to vector<8x128xf32>
    %40 = arith.addf %38, %39 : vector<8x128xf32>
    %c0_25 = arith.constant 0 : index
    %c0_26 = arith.constant 0 : index
    %41 = vector.load %arg11[%c0_25, %c0_26] : memref<8x128xf32, #tpu.memory_space<vmem>>, vector<8x128xf32>
    tpu.vector_store %arg11[%c0_25, %c0_26], %40 {strides = array<i32>} : memref<8x128xf32, #tpu.memory_space<vmem>>, vector<8x128xf32>,
    %c0_27 = arith.constant 0 : index
    %c0_28 = arith.constant 0 : index
    %42 = vector.load %arg12[%c0_27, %c0_28] : memref<8x128xf32, #tpu.memory_space<vmem>>, vector<8x128xf32>
    tpu.vector_store %arg12[%c0_27, %c0_28], %17 {strides = array<i32>} : memref<8x128xf32, #tpu.memory_space<vmem>>, vector<8x128xf32>,
    %c0_29 = arith.constant 0 : index
    %c0_30 = arith.constant 0 : index
    %43 = vector.load %arg13[%c0_29, %c0_30] : memref<8x128xf32, #tpu.memory_space<vmem>>, vector<8x128xf32>
    tpu.vector_store %arg13[%c0_29, %c0_30], %18 {strides = array<i32>} : memref<8x128xf32, #tpu.memory_space<vmem>>, vector<8x128xf32>,
    %c0_31 = arith.constant 0 : index
    %c0_32 = arith.constant 0 : index
    %44 = vector.load %arg14[%c0_31, %c0_32] : memref<8x128xf32, #tpu.memory_space<vmem>>, vector<8x128xf32>
    tpu.vector_store %arg14[%c0_31, %c0_32], %24 {strides = array<i32>} : memref<8x128xf32, #tpu.memory_space<vmem>>, vector<8x128xf32>,
    return
  }
  func.func @transform_0(%arg0: i32) -> (i32, i32) {
    %c0_i32 = arith.constant 0 : i32
    %c0_i32_0 = arith.constant 0 : i32
    return %arg0, %c0_i32 : i32, i32
  }
  func.func @transform_1(%arg0: i32) -> (i32, i32) {
    %c0_i32 = arith.constant 0 : i32
    %c0_i32_0 = arith.constant 0 : i32
    return %arg0, %c0_i32 : i32, i32
  }
  func.func @transform_2(%arg0: i32) -> (i32, i32) {
    %c0_i32 = arith.constant 0 : i32
    %c0_i32_0 = arith.constant 0 : i32
    %c0_i32_1 = arith.constant 0 : i32
    return %c0_i32, %c0_i32_0 : i32, i32
  }
  func.func @transform_3(%arg0: i32) -> (i32, i32) {
    %c0_i32 = arith.constant 0 : i32
    %c0_i32_0 = arith.constant 0 : i32
    %c0_i32_1 = arith.constant 0 : i32
    return %c0_i32, %c0_i32_0 : i32, i32
  }
  func.func @transform_4(%arg0: i32) -> (i32, i32) {
    %c0_i32 = arith.constant 0 : i32
    %c0_i32_0 = arith.constant 0 : i32
    %c0_i32_1 = arith.constant 0 : i32
    return %c0_i32, %c0_i32_0 : i32, i32
  }
  func.func @transform_5(%arg0: i32) -> (i32, i32) {
    %c0_i32 = arith.constant 0 : i32
    %c0_i32_0 = arith.constant 0 : i32
    %c0_i32_1 = arith.constant 0 : i32
    return %c0_i32, %c0_i32_0 : i32, i32
  }
  func.func @transform_6(%arg0: i32) -> (i32, i32) {
    %c0_i32 = arith.constant 0 : i32
    %c0_i32_0 = arith.constant 0 : i32
    %c0_i32_1 = arith.constant 0 : i32
    return %c0_i32, %c0_i32_0 : i32, i32
  }
  func.func @transform_7(%arg0: i32) -> (i32, i32) {
    %c0_i32 = arith.constant 0 : i32
    %c0_i32_0 = arith.constant 0 : i32
    %c0_i32_1 = arith.constant 0 : i32
    return %c0_i32, %c0_i32_0 : i32, i32
  }
  func.func @transform_8(%arg0: i32) -> (i32, i32) {
    %c0_i32 = arith.constant 0 : i32
    %c0_i32_0 = arith.constant 0 : i32
    %c0_i32_1 = arith.constant 0 : i32
    return %c0_i32, %c0_i32_0 : i32, i32
  }
  func.func @transform_9(%arg0: i32) -> (i32, i32) {
    %c0_i32 = arith.constant 0 : i32
    %c0_i32_0 = arith.constant 0 : i32
    %c0_i32_1 = arith.constant 0 : i32
    return %c0_i32, %c0_i32_0 : i32, i32
  }
  func.func @transform_10(%arg0: i32) -> (i32, i32) {
    %c0_i32 = arith.constant 0 : i32
    %c0_i32_0 = arith.constant 0 : i32
    return %arg0, %c0_i32 : i32, i32
  }
  func.func @transform_11(%arg0: i32) -> (i32, i32) {
    %c0_i32 = arith.constant 0 : i32
    %c0_i32_0 = arith.constant 0 : i32
    return %arg0, %c0_i32 : i32, i32
  }
  func.func @transform_12(%arg0: i32) -> (i32, i32) {
    %c0_i32 = arith.constant 0 : i32
    %c0_i32_0 = arith.constant 0 : i32
    return %arg0, %c0_i32 : i32, i32
  }
  func.func @transform_13(%arg0: i32) -> (i32, i32) {
    %c0_i32 = arith.constant 0 : i32
    %c0_i32_0 = arith.constant 0 : i32
    return %arg0, %c0_i32 : i32, i32
  }
}

</mosaic_0001>

<bundles_post_ra>
// kernel: vae_forward.1
= control target key start
LH: loop header
LB: loop body
LE: loop exit
PB: predicated region body
PF: predicated region fallthrough
CT: control target
= control target key end

     0   :  { %19 = vsyncpa [#allocation3], 0  ;;  %s1180_s0 = inlined_call_operand.vmem [shape: f32[8,128], index: 0, kind: input, shape index: {}]   ;;  %s1181_s1 = inlined_call_operand.vmem [shape: f32[8,128], index: 1, kind: input, shape index: {}]   ;;  %s1182_s2 = inlined_call_operand.vmem [shape: f32[128,128], index: 2, kind: input, shape index: {}]   ;;  %s1183_s3 = inlined_call_operand.vmem [shape: f32[1,128], index: 3, kind: input, shape index: {}]   ;;  %s1184_s4 = inlined_call_operand.vmem [shape: f32[128,256], index: 4, kind: input, shape index: {}]   ;;  %s1185_s5 = inlined_call_operand.vmem [shape: f32[1,256], index: 5, kind: input, shape index: {}]   ;;  %s1186_s6 = inlined_call_operand.vmem [shape: f32[128,128], index: 6, kind: input, shape index: {}]   ;;  %s1187_s7 = inlined_call_operand.vmem [shape: f32[1,128], index: 7, kind: input, shape index: {}]   ;;  %s1188_s8 = inlined_call_operand.vmem [shape: f32[128,128], index: 8, kind: input, shape index: {}]   ;;  %s1189_s9 = inlined_call_operand.vmem [shape: f32[1,128], index: 9, kind: input, shape index: {}]   ;;  %s1190_s10 = inlined_call_operand.hbm [shape: f32[8,128], index: 10, kind: output, shape index: {0}]   ;;  %s1191_s11 = inlined_call_operand.hbm [shape: f32[8,128], index: 11, kind: output, shape index: {1}]   ;;  %s1192_s12 = inlined_call_operand.hbm [shape: f32[8,128], index: 12, kind: output, shape index: {2}]   ;;  %s1193_s13 = inlined_call_operand.hbm [shape: f32[8,128], index: 13, kind: output, shape index: {3}]  }
   0x1   :  { %20 = vsyncpa [#allocation5], 0  ;;  %v58_v0 = vld [vmem:[%s1182_s2 + $0x78] sm:$0xff]  ;;  %v779_v1 = vmov 0.0   ;;  %v57_v2 = vld [vmem:[%s1182_s2 + $0x70] sm:$0xff]  ;;  %vm780_vm0 = vmmov 0  }
   0x2   :  { %572 = vmatprep.subr.mxu0 %v779_v1  ;;  %604 = vmatprep.mubr.msk.f32.mxu0 %vm780_vm0, %v779_v1  ;;  %v56_v3 = vld [vmem:[%s1182_s2 + $0x68] sm:$0xff]  ;;  %v55_v4 = vld [vmem:[%s1182_s2 + $0x60] sm:$0xff] }
   0x3   :  { %573 = vmatpush3.msra.mxu0 %v58_v0  ;;  %251 = vmatprep.mubr.f32.mxu1 %v779_v1 }
   0x4   :  { %574 = vmatprep.subr.mxu0 %v779_v1 }
   0x5   :  { %575 = vmatpush3.msra.mxu0 %v57_v2 }
   0x6   :  { %576 = vmatprep.subr.mxu0 %v779_v1 }
   0x7   :  { %577 = vmatpush3.msra.mxu0 %v56_v3 }
   0x8   :  { %21 = vsyncpa [#allocation8], 0  ;;  %578 = vmatprep.subr.mxu0 %v779_v1  ;;  %v54_v5 = vld [vmem:[%s1182_s2 + $0x58] sm:$0xff]  ;;  %v53_v6 = vld [vmem:[%s1182_s2 + $0x50] sm:$0xff]  ;;  %s781_s16 = smov [#allocation4]  }
   0x9   :  { %579 = vmatpush3.msra.mxu0 %v55_v4  ;;  %v52_v7 = vld [vmem:[%s1182_s2 + $0x48] sm:$0xff]  ;;  %v51_v8 = vld [vmem:[%s1182_s2 + $0x40] sm:$0xff]  ;;  %v50_v9 = vld [vmem:[%s1182_s2 + $0x38] sm:$0xff]  ;;  %s477_s17 = sshll.u32 %s781_s16, 4  ;;  %s478_s17 = int_to_ptr.vmem [resolvable:$true] %s477_s17 }
   0xa   :  { %580 = vmatprep.subr.mxu0 %v779_v1  ;;  %v49_v10 = vld [vmem:[%s1182_s2 + $0x30] sm:$0xff]  ;;  %v48_v11 = vld [vmem:[%s1182_s2 + $0x28] sm:$0xff]  ;;  %v47_v12 = vld [vmem:[%s1182_s2 + $0x20] sm:$0xff]  ;;  %p698_p1 = scmp.lt.s32.totalorder %s478_s17, %s478_s17 }
   0xb   :  { %581 = vmatpush3.msra.mxu0 %v54_v5  ;;  %v46_v13 = vld [vmem:[%s1182_s2 + $0x18] sm:$0xff]  ;;  %v45_v14 = vld [vmem:[%s1182_s2 + $0x10] sm:$0xff]  ;;  %v44_v15 = vld [vmem:[%s1182_s2 + $0x8] sm:$0xff] }
   0xc   :  { %582 = vmatprep.subr.mxu0 %v779_v1  ;;  %v43_v16 = vld [vmem:[%s1182_s2] sm:$0xff]  ;;  %v174_v18 = vld [vmem:[%s1184_s4 + $0xf8] sm:$0xff]  ;;  %v173_v19 = vld [vmem:[%s1184_s4 + $0xf0] sm:$0xff] }
   0xd   :  { %583 = vmatpush3.msra.mxu0 %v53_v6  ;;  %v42_v17 = vld [vmem:[%s1180_s0] sm:$0xff]  ;;  %187 = vmatprep.subr.mxu1 %v174_v18  ;;  %v172_v20 = vld [vmem:[%s1184_s4 + $0xe8] sm:$0xff]  ;;  %v170_v22 = vld [vmem:[%s1184_s4 + $0xd8] sm:$0xff] }
   0xe   :  { %584 = vmatprep.subr.mxu0 %v779_v1  ;;  %188 = vmatpush1.msra.mxu1 %v173_v19  ;;  %v171_v21 = vld [vmem:[%s1184_s4 + $0xe0] sm:$0xff]  ;;  %v169_v23 = vld [vmem:[%s1184_s4 + $0xd0] sm:$0xff]  ;;  %v168_v24 = vld [vmem:[%s1184_s4 + $0xc8] sm:$0xff] }
   0xf   :  { %585 = vmatpush3.msra.mxu0 %v52_v7  ;;  %189 = vmatprep.subr.mxu1 %v172_v20  ;;  %v167_v25 = vld [vmem:[%s1184_s4 + $0xc0] sm:$0xff]  ;;  %v166_v26 = vld [vmem:[%s1184_s4 + $0xb8] sm:$0xff]  ;;  %v165_v27 = vld [vmem:[%s1184_s4 + $0xb0] sm:$0xff] }
  0x10   :  { %586 = vmatprep.subr.mxu0 %v779_v1  ;;  %190 = vmatpush1.msra.mxu1 %v171_v21  ;;  %v164_v28 = vld [vmem:[%s1184_s4 + $0xa8] sm:$0xff]  ;;  %v163_v29 = vld [vmem:[%s1184_s4 + $0xa0] sm:$0xff]  ;;  %v162_v30 = vld [vmem:[%s1184_s4 + $0x98] sm:$0xff] }
  0x11   :  { %587 = vmatpush3.msra.mxu0 %v51_v8  ;;  %191 = vmatprep.subr.mxu1 %v170_v22  ;;  %v161_v31 = vld [vmem:[%s1184_s4 + $0x90] sm:$0xff]  ;;  %v160_v32 = vld [vmem:[%s1184_s4 + $0x88] sm:$0xff]  ;;  %v159_v33 = vld [vmem:[%s1184_s4 + $0x80] sm:$0xff] }
  0x12   :  { %588 = vmatprep.subr.mxu0 %v779_v1  ;;  %192 = vmatpush1.msra.mxu1 %v169_v23  ;;  %v158_v34 = vld [vmem:[%s1184_s4 + $0x78] sm:$0xff]  ;;  %v157_v35 = vld [vmem:[%s1184_s4 + $0x70] sm:$0xff]  ;;  %v156_v36 = vld [vmem:[%s1184_s4 + $0x68] sm:$0xff] }
  0x13   :  { %589 = vmatpush3.msra.mxu0 %v50_v9  ;;  %193 = vmatprep.subr.mxu1 %v168_v24  ;;  %v155_v37 = vld [vmem:[%s1184_s4 + $0x60] sm:$0xff]  ;;  %v154_v38 = vld [vmem:[%s1184_s4 + $0x58] sm:$0xff]  ;;  %v153_v39 = vld [vmem:[%s1184_s4 + $0x50] sm:$0xff] }
  0x14   :  { %590 = vmatprep.subr.mxu0 %v779_v1  ;;  %194 = vmatpush1.msra.mxu1 %v167_v25  ;;  %v152_v40 = vld [vmem:[%s1184_s4 + $0x48] sm:$0xff]  ;;  %v151_v41 = vld [vmem:[%s1184_s4 + $0x40] sm:$0xff]  ;;  %v150_v42 = vld [vmem:[%s1184_s4 + $0x38] sm:$0xff] }
  0x15   :  { %591 = vmatpush3.msra.mxu0 %v49_v10  ;;  %195 = vmatprep.subr.mxu1 %v166_v26  ;;  %v149_v43 = vld [vmem:[%s1184_s4 + $0x30] sm:$0xff]  ;;  %v148_v44 = vld [vmem:[%s1184_s4 + $0x28] sm:$0xff]  ;;  %v147_v45 = vld [vmem:[%s1184_s4 + $0x20] sm:$0xff] }
  0x16   :  { %592 = vmatprep.subr.mxu0 %v779_v1  ;;  %196 = vmatpush1.msra.mxu1 %v165_v27  ;;  %v146_v46 = vld [vmem:[%s1184_s4 + $0x18] sm:$0xff]  ;;  %v145_v47 = vld [vmem:[%s1184_s4 + $0x10] sm:$0xff]  ;;  %v144_v48 = vld [vmem:[%s1184_s4 + $0x8] sm:$0xff] }
  0x17   :  { %593 = vmatpush3.msra.mxu0 %v48_v11  ;;  %197 = vmatprep.subr.mxu1 %v164_v28  ;;  %v143_v49 = vld [vmem:[%s1184_s4] sm:$0xff]  ;;  %v279_v50 = vld [vmem:[%s1186_s6 + $0x78] sm:$0xff]  ;;  %v278_v51 = vld [vmem:[%s1186_s6 + $0x70] sm:$0xff] }
  0x18   :  { %594 = vmatprep.subr.mxu0 %v779_v1  ;;  %198 = vmatpush1.msra.mxu1 %v163_v29  ;;  %v516_v52 = vld [vmem:[%s1183_s3] ss:$0 sm:$0xff]  ;;  %v277_v61 = vld [vmem:[%s1186_s6 + $0x68] sm:$0xff]  ;;  %v275_v63 = vld [vmem:[%s1186_s6 + $0x58] sm:$0xff] }
  0x19   :  { %595 = vmatpush3.msra.mxu0 %v47_v12  ;;  %199 = vmatprep.subr.mxu1 %v162_v30  ;;  %v276_v62 = vld [vmem:[%s1186_s6 + $0x60] sm:$0xff]  ;;  %v274_v0 = vld [vmem:[%s1186_s6 + $0x50] sm:$0xff]  ;;  %v273_v2 = vld [vmem:[%s1186_s6 + $0x48] sm:$0xff]  ;;  %v177_v12 = vlaneseq }
  0x1a   :  { %596 = vmatprep.subr.mxu0 %v779_v1  ;;  %200 = vmatpush1.msra.mxu1 %v161_v31  ;;  %v272_v3 = vld [vmem:[%s1186_s6 + $0x40] sm:$0xff]  ;;  %v271_v4 = vld [vmem:[%s1186_s6 + $0x38] sm:$0xff]  ;;  %v270_v5 = vld [vmem:[%s1186_s6 + $0x30] sm:$0xff] }
  0x1b   :  { %597 = vmatpush3.msra.mxu0 %v46_v13  ;;  %201 = vmatprep.subr.mxu1 %v160_v32  ;;  %v269_v6 = vld [vmem:[%s1186_s6 + $0x28] sm:$0xff]  ;;  %v268_v7 = vld [vmem:[%s1186_s6 + $0x20] sm:$0xff]  ;;  %v267_v8 = vld [vmem:[%s1186_s6 + $0x18] sm:$0xff]  ;;  %v178_v13 = vshrl.u32 %v177_v12, 7 }
  0x1c   :  { %598 = vmatprep.subr.mxu0 %v779_v1  ;;  %202 = vmatpush1.msra.mxu1 %v159_v33  ;;  %v266_v9 = vld [vmem:[%s1186_s6 + $0x10] sm:$0xff]  ;;  %v265_v10 = vld [vmem:[%s1186_s6 + $0x8] sm:$0xff]  ;;  %v264_v11 = vld [vmem:[%s1186_s6] sm:$0xff] }
  0x1d   :  { %599 = vmatpush3.msra.mxu0 %v45_v14  ;;  %203 = vmatprep.subr.mxu1 %v158_v34  ;;  %v179_v14 = vsub.s32 0, %v178_v13  ;;  %v261_v25 = vld [vmem:[%s1181_s1] sm:$0xff]  ;;  %v379_v29 = vld [vmem:[%s1188_s8 + $0x78] sm:$0xff]  ;;  %v378_v30 = vld [vmem:[%s1188_s8 + $0x70] sm:$0xff] }
  0x1e   :  { %600 = vmatprep.subr.mxu0 %v779_v1  ;;  %204 = vmatpush1.msra.mxu1 %v157_v35  ;;  %v377_v31 = vld [vmem:[%s1188_s8 + $0x68] sm:$0xff]  ;;  %v376_v32 = vld [vmem:[%s1188_s8 + $0x60] sm:$0xff]  ;;  %v375_v33 = vld [vmem:[%s1188_s8 + $0x58] sm:$0xff] }
  0x1f   :  { %601 = vmatpush3.msra.mxu0 %v44_v15  ;;  %205 = vmatprep.subr.mxu1 %v156_v36  ;;  %v175_v15 = vld [vmem:[%s1185_s5] sm:$0x3]  ;;  %v374_v34 = vld [vmem:[%s1188_s8 + $0x50] sm:$0xff]  ;;  %v373_v35 = vld [vmem:[%s1188_s8 + $0x48] sm:$0xff] }
  0x20   :  { %602 = vmatprep.subr.mxu0 %v779_v1  ;;  %206 = vmatpush1.msra.mxu1 %v155_v37  ;;  %v372_v36 = vld [vmem:[%s1188_s8 + $0x40] sm:$0xff]  ;;  %v371_v37 = vld [vmem:[%s1188_s8 + $0x38] sm:$0xff] }
  0x21   :  { %603 = vmatpush3.msra.mxu0 %v43_v16  ;;  %207 = vmatprep.subr.mxu1 %v154_v38  ;;  %v183_v16 = vsub.s32 1, %v178_v13  ;;  %v370_v38 = vld [vmem:[%s1188_s8 + $0x30] sm:$0xff] }
  0x22   :  { %605 = vmatmul.mubr.f32.vlgmr.msra.gmra.mxu0 %v42_v17  ;;  %607 = vmatprep.subr.mxu0 %v779_v1  ;;  %v180_v17 = vrot.slane %v175_v15, %v179_v14 }
  0x23   :  { %639 = vmatprep.mubr.msk.f32.mxu0 %vm780_vm0, %v779_v1  ;;  %208 = vmatpush1.msra.mxu1 %v153_v39  ;;  %v184_v18 = vrot.slane %v175_v15, %v183_v16  ;;  %v369_v39 = vld [vmem:[%s1188_s8 + $0x28] sm:$0xff] }
  0x24   :  { %209 = vmatprep.subr.mxu1 %v152_v40  ;;  %608 = vmatpush3.msra.mxu0 %v279_v50  ;;  %v368_v40 = vld [vmem:[%s1188_s8 + $0x20] sm:$0xff] }
  0x25   :  { %210 = vmatpush1.msra.mxu1 %v151_v41  ;;  %609 = vmatprep.subr.mxu0 %v779_v1  ;;  %v367_v41 = vld [vmem:[%s1188_s8 + $0x18] sm:$0xff] }
  0x26   :  { %211 = vmatprep.subr.mxu1 %v150_v42  ;;  %610 = vmatpush3.msra.mxu0 %v278_v51  ;;  %v366_v42 = vld [vmem:[%s1188_s8 + $0x10] sm:$0xff] }
  0x27   :  { %212 = vmatpush1.msra.mxu1 %v149_v43  ;;  %611 = vmatprep.subr.mxu0 %v779_v1  ;;  %v365_v43 = vld [vmem:[%s1188_s8 + $0x8] sm:$0xff] }
  0x28   :  { %213 = vmatprep.subr.mxu1 %v148_v44  ;;  %612 = vmatpush3.msra.mxu0 %v277_v61  ;;  %v364_v44 = vld [vmem:[%s1188_s8] sm:$0xff]  ;;  %s693_s8 = scalar_lea.vmem %s478_s17, 128 }
  0x29   :  { %214 = vmatpush1.msra.mxu1 %v147_v45  ;;  %613 = vmatprep.subr.mxu0 %v779_v1  ;;  %v518_v45 = vld [vmem:[%s1187_s7] ss:$0 sm:$0xff]  ;;  %p694_p0 = scmp.ne.s32.totalorder %s478_s17, %s693_s8  ;;  %p699_p2 = scmp.lt.s32.totalorder %s693_s8, %s693_s8 }
  0x2a   :  { %215 = vmatprep.subr.mxu1 %v146_v46  ;;  %614 = vmatpush3.msra.mxu0 %v276_v62 }
  0x2b   :  { %216 = vmatpush1.msra.mxu1 %v145_v47  ;;  %615 = vmatprep.subr.mxu0 %v779_v1  ;;  %p700_p3 = por %p699_p2, %p698_p1 }
  0x2c   :  { %217 = vmatprep.subr.mxu1 %v144_v48  ;;  %616 = vmatpush3.msra.mxu0 %v275_v63 }
  0x2d   :  { %218 = vmatpush1.msra.mxu1 %v143_v49  ;;  %617 = vmatprep.subr.mxu0 %v779_v1  ;;  %p701_p4 = pnand %p700_p3, %p694_p0 }
  0x2e   :  { %642 = vmatprep.subr.mxu1 %v779_v1  ;;  %618 = vmatpush3.msra.mxu0 %v274_v0 }
  0x2f   :  { %619 = vmatprep.subr.mxu0 %v779_v1 }
  0x30   :  { %620 = vmatpush3.msra.mxu0 %v273_v2 }
  0x31   :  { %621 = vmatprep.subr.mxu0 %v779_v1 }
  0x32   :  { %622 = vmatpush3.msra.mxu0 %v272_v3 }
  0x33   :  { %623 = vmatprep.subr.mxu0 %v779_v1 }
  0x34   :  { %624 = vmatpush3.msra.mxu0 %v271_v4 }
  0x35   :  { %625 = vmatprep.subr.mxu0 %v779_v1 }
  0x36   :  { %626 = vmatpush3.msra.mxu0 %v270_v5 }
  0x37   :  { %627 = vmatprep.subr.mxu0 %v779_v1 }
  0x38   :  { %628 = vmatpush3.msra.mxu0 %v269_v6 }
  0x39   :  { %629 = vmatprep.subr.mxu0 %v779_v1 }
  0x3a   :  { %630 = vmatpush3.msra.mxu0 %v268_v7 }
  0x3b   :  { %631 = vmatprep.subr.mxu0 %v779_v1 }
  0x3c   :  { %632 = vmatpush3.msra.mxu0 %v267_v8 }
  0x3d   :  { %633 = vmatprep.subr.mxu0 %v779_v1 }
  0x3e   :  { %634 = vmatpush3.msra.mxu0 %v266_v9 }
  0x3f   :  { %635 = vmatprep.subr.mxu0 %v779_v1 }
  0x40   :  { %636 = vmatpush3.msra.mxu0 %v265_v10 }
  0x41   :  { %637 = vmatprep.subr.mxu0 %v779_v1 }
  0x42   :  { %638 = vmatpush3.msra.mxu0 %v264_v11 }
  0xe2   :  { %v132_v53 = vpop.f32.mrf.mxu0 }
  0xe3   :  { %v133_v54 = vadd.f32 %v516_v52, %v132_v53 }
  0xe4   :  { %v606_v55 = vpop.f32.mrf.mxu0 }
  0xe5   :  { %v517_v56 = vmul.f32 -1.442695, %v133_v54 }
  0xe7   :  { %683 = vpow2.f32 %v517_v56 }
  0xf4   :  { %v684_v57 = vpop.eup %683 }
  0xf5   :  { %v139_v58 = vadd.f32 1.0, %v684_v57 }
  0xf7   :  { %685 = vrcp.f32 %v139_v58 }
 0x104   :  { %v686_v59 = vpop.eup %685 }
 0x105   :  { %v142_v60 = vmul.f32 %v686_v59, %v133_v54 }
 0x107   :  { %252 = vmatmul.mubr.f32.vlgmr.msra.gmra.mxu1 %v142_v60 }
 0x108   :  { %674 = vmatprep.mubr.msk.f32.mxu1 %vm780_vm0, %v779_v1  ;;  %643 = vmatpush3.msra.mxu1 %v379_v29 }
 0x109   :  { %644 = vmatprep.subr.mxu1 %v779_v1 }
 0x10a   :  { %645 = vmatpush3.msra.mxu1 %v378_v30 }
 0x10b   :  { %646 = vmatprep.subr.mxu1 %v779_v1 }
 0x10c   :  { %647 = vmatpush3.msra.mxu1 %v377_v31 }
 0x10d   :  { %648 = vmatprep.subr.mxu1 %v779_v1 }
 0x10e   :  { %649 = vmatpush3.msra.mxu1 %v376_v32 }
 0x10f   :  { %650 = vmatprep.subr.mxu1 %v779_v1 }
 0x110   :  { %651 = vmatpush3.msra.mxu1 %v375_v33 }
 0x111   :  { %652 = vmatprep.subr.mxu1 %v779_v1 }
 0x112   :  { %653 = vmatpush3.msra.mxu1 %v374_v34 }
 0x113   :  { %654 = vmatprep.subr.mxu1 %v779_v1 }
 0x114   :  { %655 = vmatpush3.msra.mxu1 %v373_v35 }
 0x115   :  { %656 = vmatprep.subr.mxu1 %v779_v1 }
 0x116   :  { %657 = vmatpush3.msra.mxu1 %v372_v36 }
 0x117   :  { %658 = vmatprep.subr.mxu1 %v779_v1 }
 0x118   :  { %659 = vmatpush3.msra.mxu1 %v371_v37 }
 0x119   :  { %660 = vmatprep.subr.mxu1 %v779_v1 }
 0x11a   :  { %661 = vmatpush3.msra.mxu1 %v370_v38 }
 0x11b   :  { %662 = vmatprep.subr.mxu1 %v779_v1 }
 0x11c   :  { %663 = vmatpush3.msra.mxu1 %v369_v39 }
 0x11d   :  { %664 = vmatprep.subr.mxu1 %v779_v1 }
 0x11e   :  { %665 = vmatpush3.msra.mxu1 %v368_v40 }
 0x11f   :  { %666 = vmatprep.subr.mxu1 %v779_v1 }
 0x120   :  { %667 = vmatpush3.msra.mxu1 %v367_v41 }
 0x121   :  { %668 = vmatprep.subr.mxu1 %v779_v1 }
 0x122   :  { %669 = vmatpush3.msra.mxu1 %v366_v42 }
 0x123   :  { %670 = vmatprep.subr.mxu1 %v779_v1 }
 0x124   :  { %671 = vmatpush3.msra.mxu1 %v365_v43 }
 0x125   :  { %672 = vmatprep.subr.mxu1 %v779_v1 }
 0x126   :  { %673 = vmatpush3.msra.mxu1 %v364_v44 }
 0x1c7   :  { %v253_v19 = vpop.f32.mrf.mxu1 }
 0x1c8   :  { %v254_v20 = vadd.f32 %v253_v19, %v180_v17 }
 0x1c9   :  { %v255_v21 = vpop.f32.mrf.mxu1 }
 0x1ca   :  { %458 = vst [vmem:[#allocation4] sm:$0xff] %v254_v20  ;;  %v256_v22 = vadd.f32 %v255_v21, %v184_v18 }
 0x1cc   :  { %v258_v23 = vmul.f32 0.5, %v256_v22  ;;  %459 = vst [vmem:[#allocation6] sm:$0xff] %v256_v22 }
 0x1ce   :  { %v259_v24 = vmul.f32 1.442695, %v258_v23 }
 0x1d0   :  { %687 = vpow2.f32 %v259_v24 }
 0x1dd   :  { %v688_v26 = vpop.eup %687 }
 0x1de   :  { %v262_v27 = vmul.f32 %v688_v26, %v261_v25 }
 0x1e0   :  { %v263_v28 = vadd.f32 %v262_v27, %v254_v20 }
 0x1e2   :  { %640 = vmatmul.mubr.f32.vlgmr.msra.gmra.mxu0 %v263_v28  ;;  %460 = vst [vmem:[#allocation7] sm:$0xff] %v263_v28 }
 0x2a2   :  { %v353_v46 = vpop.f32.mrf.mxu0 }
 0x2a3   :  { %v354_v47 = vadd.f32 %v518_v45, %v353_v46 }
 0x2a4   :  { %v641_v48 = vpop.f32.mrf.mxu0 }
 0x2a5   :  { %v519_v49 = vmul.f32 -1.442695, %v354_v47 }
 0x2a7   :  { %689 = vpow2.f32 %v519_v49 }
 0x2b4   :  { %v690_v50 = vpop.eup %689 }
 0x2b5   :  { %v360_v51 = vadd.f32 1.0, %v690_v50 }
 0x2b7   :  { %691 = vrcp.f32 %v360_v51 }
 0x2c4   :  { %v692_v52 = vpop.eup %691 }
 0x2c5   :  { %v363_v53 = vmul.f32 %v692_v52, %v354_v47 }
 0x2c7   :  { %675 = vmatmul.mubr.f32.vlgmr.msra.gmra.mxu1 %v363_v53 }
 0x2c8   :  { %704 = shalt.err (!%p701_p4)
}
 0x2c9   :  { %480 = dma.vmem_to_hbm [thread:$0]  %s478_s17, 128, %s1191_s11, [#allocation5]  }
 0x2ca   :  { %s782_s4 = smov [#allocation6]   ;;  %s783_s3 = smov [#allocation7]  }
 0x2cb   :  { %s487_s19 = sshll.u32 %s782_s4, 4  ;;  %s497_s20 = sshll.u32 %s783_s3, 4  ;;  %s488_s19 = int_to_ptr.vmem [resolvable:$true] %s487_s19  ;;  %s498_s20 = int_to_ptr.vmem [resolvable:$true] %s497_s20 }
 0x2cc   :  { %s713_s21 = scalar_lea.vmem %s488_s19, 128  ;;  %p718_p6 = scmp.lt.s32.totalorder %s488_s19, %s488_s19 }
 0x2cd   :  { %p714_p5 = scmp.ne.s32.totalorder %s488_s19, %s713_s21  ;;  %p719_p7 = scmp.lt.s32.totalorder %s713_s21, %s713_s21 }
 0x2cf   :  { %p720_p8 = por %p719_p7, %p718_p6 }
 0x2d1   :  { %p721_p9 = pnand %p720_p8, %p714_p5 }
 0x2d3   :  { %724 = shalt.err (!%p721_p9)
}
 0x2d4   :  { %490 = dma.vmem_to_hbm [thread:$0]  %s488_s19, 128, %s1192_s12, [#allocation5]  }
 0x2d5   :  { %s733_s24 = scalar_lea.vmem %s498_s20, 128  ;;  %p738_p11 = scmp.lt.s32.totalorder %s498_s20, %s498_s20 }
 0x2d6   :  { %p734_p10 = scmp.ne.s32.totalorder %s498_s20, %s733_s24  ;;  %p739_p12 = scmp.lt.s32.totalorder %s733_s24, %s733_s24 }
 0x2d8   :  { %p740_p13 = por %p739_p12, %p738_p11 }
 0x2da   :  { %p741_p0 = pnand %p740_p13, %p734_p10 }
 0x2dc   :  { %744 = shalt.err (!%p741_p0)
}
 0x2dd   :  { %500 = dma.vmem_to_hbm [thread:$0]  %s498_s20, 128, %s1193_s13, [#allocation8]   ;;  %v520_v1 = vld [vmem:[%s1189_s9] ss:$0 sm:$0xff] }
 0x2de   :  { %s784_s5 = smov [#allocation2]  }
 0x2df   :  { %s467_s2 = sshll.u32 %s784_s5, 4  ;;  %s468_s2 = int_to_ptr.vmem [resolvable:$true] %s467_s2 }
 0x2e0   :  { %s753_s12 = scalar_lea.vmem %s468_s2, 128  ;;  %p758_p2 = scmp.lt.s32.totalorder %s468_s2, %s468_s2 }
 0x2e1   :  { %p754_p1 = scmp.ne.s32.totalorder %s468_s2, %s753_s12  ;;  %p759_p3 = scmp.lt.s32.totalorder %s753_s12, %s753_s12 }
 0x2e3   :  { %p760_p4 = por %p759_p3, %p758_p2 }
 0x2e5   :  { %p761_p5 = pnand %p760_p4, %p754_p1 }
 0x387   :  { %v453_v54 = vpop.f32.mrf.mxu1 }
 0x388   :  { %v454_v55 = vadd.f32 %v520_v1, %v453_v54 }
 0x389   :  { %v676_v56 = vpop.f32.mrf.mxu1 }
 0x38a   :  { %457 = vst [vmem:[#allocation2] sm:$0xff] %v454_v55 }
 0x38b   :  { %764 = shalt.err (!%p761_p5)
}
 0x38c   :  { %470 = dma.vmem_to_hbm [thread:$0]  %s468_s2, 128, %s1190_s10, [#allocation3]  }
 0x38d   :  { %773 = dma.done.wait [#allocation3], 128  }
 0x38e   :  { %774 = vsyncadd [#allocation3], 4294967168 }
 0x38f   :  { %775 = dma.done.wait [#allocation5], 256  }
 0x390   :  { %776 = vsyncadd [#allocation5], 4294967040 }
 0x391   :  { %777 = dma.done.wait [#allocation8], 128  }
 0x392   :  { %778 = vsyncadd [#allocation8], 4294967168 }
 0x393   :  { %513 = vsyncpa [#allocation3], 1 }
 0x394   :  { %514 = vsyncpa [#allocation5], 1 }
 0x395   :  { %515 = vsyncpa [#allocation8], 1 }

</bundles_post_ra>
